<compile_context>
chip_gen: v5e
topology: v5e:2x2
jax: 0.10.0
libtpu: 0.0.40
codegen_flags: <defaults>
</compile_context>

<pallas_src>
import jax
import jax.numpy as jnp
import numpy as np
from jax import lax
from jax.experimental import pallas as pl
from jax.experimental.pallas import tpu as pltpu


def lstm_head_kernel(x_ref, wih_ref, whh_ref, b_ref, wfc_ref, bfc_ref, out_ref):
    """x_ref:  (T*Bp, D_in) f32, time-major rows (row = t*Bp + b), Bp = padded batch
       wih_ref:(D_in, 4H) f32;  whh_ref: (H, 4H) bf16;  b_ref: (1, 4H) f32
       wfc_ref:(H, O) f32;      bfc_ref: (1, O) f32;    out_ref: (Bp, O) f32
    """
    Bp = out_ref.shape[0]
    T = x_ref.shape[0] // Bp
    H = whh_ref.shape[0]

    # Recurrence-independent input projection + bias, hoisted out of the loop:
    # one f32 MXU matmul over all T*Bp rows (runs once, off the per-step chain),
    # bias broadcast-added exactly once.
    xw = (jnp.dot(x_ref[...], wih_ref[...], preferred_element_type=jnp.float32)
          + b_ref[...])                                   # (T*Bp, 4H) f32

    whh = whh_ref[...]                                    # (H, 4H) bf16, hoisted

    # State lives in vregs (no VMEM scratch on the serial chain).
    # h carried in bf16 (the MXU operand); last-step f32 h kept for the head.
    h_bf = jnp.zeros((Bp, H), jnp.bfloat16)
    h = jnp.zeros((Bp, H), jnp.float32)
    c = jnp.zeros((Bp, H), jnp.float32)

    # T is tiny and static: fully unrolled at trace time so every xw slice is a
    # static, sublane-aligned (Bp, 4H) slab and the scheduler sees across steps.
    for t in range(T):
        gates = xw[t * Bp:(t + 1) * Bp, :] + jnp.dot(
            h_bf, whh, preferred_element_type=jnp.float32)        # (Bp, 4H) f32
        # Activations on the full (Bp, 4H) vreg: exactly two tanh EUP pushes per
        # step (sigmoid via its tanh form); slice the 32-lane gate blocks after.
        s = 0.5 * (1.0 + jnp.tanh(0.5 * gates))           # sigmoid of all gates
        g = jnp.tanh(gates)
        i_g = s[:, 0 * H:1 * H]
        f_g = s[:, 1 * H:2 * H]
        g_g = g[:, 2 * H:3 * H]
        o_g = s[:, 3 * H:4 * H]
        c = f_g * c + i_g * g_g
        h = o_g * jnp.tanh(c)
        h_bf = h.astype(jnp.bfloat16)      # cast folded into the state update

    # relu -> fc -> softmax on the last hidden state (f32; runs exactly once so
    # it is not on the per-step critical path).
    h_relu = jnp.maximum(h, 0.0)
    logits = jnp.dot(h_relu, wfc_ref[...],
                     preferred_element_type=jnp.float32) + bfc_ref[...]
    m = jnp.max(logits, axis=-1, keepdims=True)
    e = jnp.exp(logits - m)
    inv_denom = pl.reciprocal(jnp.sum(e, axis=-1, keepdims=True), approx=True)
    out_ref[...] = e * inv_denom


@jax.jit
def lstm_basic_dropout_forward(x_bct, w_ih, w_hh, b_ih, b_hh, w_fc, b_fc):
    """x_bct: (B, input_dim, T), exactly like the PyTorch module's input."""
    B, D, T = x_bct.shape
    H = w_hh.shape[1]
    O = w_fc.shape[0]
    Bp = ((B + 7) // 8) * 8     # pad batch to a full sublane group (8 rows)

    # Single transpose (B, D, T) -> (T, B, D), zero-pad batch to Bp, flatten so
    # the kernel's hoisted input projection is one (T*Bp, D) @ (D, 4H) matmul.
    # Input projection operands stay f32 (accuracy, off the critical path);
    # only the recurrent weight is cast to bf16 for the per-step MXU matmul.
    x_tbd = jnp.transpose(x_bct, (2, 0, 1))                # (T, B, D)
    x_tbd = jnp.pad(x_tbd, ((0, 0), (0, Bp - B), (0, 0)))  # (T, Bp, D)
    x_flat = x_tbd.reshape(T * Bp, D)                      # (T*Bp, D) f32

    wih_t = jnp.transpose(w_ih)                            # (D, 4H) f32
    whh_t = jnp.transpose(w_hh).astype(jnp.bfloat16)       # (H, 4H) bf16
    b = (b_ih + b_hh).reshape(1, 4 * H)                    # (1, 4H) f32
    wfc_t = jnp.transpose(w_fc)                            # (H, O)  f32
    bfc = b_fc.reshape(1, O)                               # (1, O)  f32

    # Everything (a few KB) fits comfortably in VMEM on v5e/v6e/v7x; no grid,
    # no pipelining needed — the kernel is purely latency-bound at these shapes.
    out_padded = pl.pallas_call(
        lstm_head_kernel,
        out_shape=jax.ShapeDtypeStruct((Bp, O), jnp.float32),
        in_specs=[pl.BlockSpec(memory_space=pltpu.MemorySpace.VMEM)] * 6,
        out_specs=pl.BlockSpec(memory_space=pltpu.MemorySpace.VMEM),
    )(x_flat, wih_t, whh_t, b, wfc_t, bfc)
    return out_padded[:B]


def reference_forward(x_bct, w_ih, w_hh, b_ih, b_hh, w_fc, b_fc):
    """Pure-JAX f32 reference replicating the PyTorch module."""
    x_btd = jnp.transpose(x_bct, (0, 2, 1))
    B, T, _ = x_btd.shape
    H = w_hh.shape[1]
    h = jnp.zeros((B, H), jnp.float32)
    c = jnp.zeros((B, H), jnp.float32)

    def step(carry, x_t):
        h, c = carry
        gates = x_t @ w_ih.T + b_ih + h @ w_hh.T + b_hh
        i_g, f_g, g_g, o_g = jnp.split(gates, 4, axis=-1)
        c = jax.nn.sigmoid(f_g) * c + jax.nn.sigmoid(i_g) * jnp.tanh(g_g)
        h = jax.nn.sigmoid(o_g) * jnp.tanh(c)
        return (h, c), h

    (h, c), _ = lax.scan(step, (h, c), jnp.transpose(x_btd, (1, 0, 2)))
    logits = jnp.maximum(h, 0.0) @ w_fc.T + b_fc
    return jax.nn.softmax(logits, axis=-1)


if __name__ == "__main__":
    # Small shapes consistent with the module's forward.
    input_dim = 4
    recurrent_dim = 32   # hidden size H
    output_dim = 8
    B, T = 2, 8

    key = jax.random.PRNGKey(0)
    ks = jax.random.split(key, 8)
    k = 1.0 / np.sqrt(recurrent_dim)

    # PyTorch-style init: U(-1/sqrt(H), 1/sqrt(H)).
    w_ih = jax.random.uniform(ks[0], (4 * recurrent_dim, input_dim),
                              jnp.float32, -k, k)
    w_hh = jax.random.uniform(ks[1], (4 * recurrent_dim, recurrent_dim),
                              jnp.float32, -k, k)
    b_ih = jax.random.uniform(ks[2], (4 * recurrent_dim,), jnp.float32, -k, k)
    b_hh = jax.random.uniform(ks[3], (4 * recurrent_dim,), jnp.float32, -k, k)
    w_fc = jax.random.uniform(ks[4], (output_dim, recurrent_dim),
                              jnp.float32, -k, k)
    b_fc = jax.random.uniform(ks[5], (output_dim,), jnp.float32, -k, k)

    # Input as the PyTorch module receives it: (B, input_dim, T).
    x = jax.random.normal(ks[6], (B, input_dim, T), jnp.float32)

    out = lstm_basic_dropout_forward(x, w_ih, w_hh, b_ih, b_hh, w_fc, b_fc)
    out = jax.block_until_ready(out)

    ref = reference_forward(x, w_ih, w_hh, b_ih, b_hh, w_fc, b_fc)
    np.testing.assert_allclose(np.asarray(out), np.asarray(ref),
                               rtol=1e-3, atol=1e-3)
    assert out.shape == (B, output_dim)

    print("KERNEL_OK")
</pallas_src>

<mosaic_0001>
module attributes {stable_mosaic.version = 11 : i64} {
  func.func @lstm_head_kernel(%arg0: memref<64x4xf32, #tpu.memory_space<vmem>>, %arg1: memref<4x128xf32, #tpu.memory_space<vmem>>, %arg2: memref<32x128xbf16, #tpu.memory_space<vmem>>, %arg3: memref<1x128xf32, #tpu.memory_space<vmem>>, %arg4: memref<32x8xf32, #tpu.memory_space<vmem>>, %arg5: memref<1x8xf32, #tpu.memory_space<vmem>>, %arg6: memref<8x8xf32, #tpu.memory_space<vmem>>) attributes {dimension_semantics = [], scalar_prefetch = 0 : i64, scratch_operands = 0 : i64, tpu.core_type = #tpu.core_type<tc>} {
    %c0 = arith.constant 0 : index
    %c0_0 = arith.constant 0 : index
    %0 = vector.load %arg0[%c0, %c0_0] : memref<64x4xf32, #tpu.memory_space<vmem>>, vector<64x4xf32>
    %c0_1 = arith.constant 0 : index
    %c0_2 = arith.constant 0 : index
    %1 = vector.load %arg1[%c0_1, %c0_2] : memref<4x128xf32, #tpu.memory_space<vmem>>, vector<4x128xf32>
    %cst = arith.constant dense<0.000000e+00> : vector<64x128xf32>
    %2 = tpu.matmul %0, %1, %cst {dimension_numbers = #tpu.dot_dimension_numbers<[1], [0], [0], [1], [0, 0, 1, 1], [], []>} : vector<64x4xf32>, vector<4x128xf32>, vector<64x128xf32> -> vector<64x128xf32>
    %c0_3 = arith.constant 0 : index
    %c0_4 = arith.constant 0 : index
    %3 = vector.load %arg3[%c0_3, %c0_4] : memref<1x128xf32, #tpu.memory_space<vmem>>, vector<1x128xf32>
    %4 = vector.broadcast %3 : vector<1x128xf32> to vector<64x128xf32>
    %5 = arith.addf %2, %4 : vector<64x128xf32>
    %c0_5 = arith.constant 0 : index
    %c0_6 = arith.constant 0 : index
    %6 = vector.load %arg2[%c0_5, %c0_6] : memref<32x128xbf16, #tpu.memory_space<vmem>>, vector<32x128xbf16>
    %cst_7 = arith.constant 0.000000e+00 : bf16
    %7 = vector.broadcast %cst_7 : bf16 to vector<8x32xbf16>
    %cst_8 = arith.constant 0.000000e+00 : f32
    %8 = vector.broadcast %cst_8 : f32 to vector<8x32xf32>
    %9 = vector.extract_strided_slice %5 {offsets = [0, 0], sizes = [8, 128], strides = [1, 1]} : vector<64x128xf32> to vector<8x128xf32>
    %cst_9 = arith.constant dense<0.000000e+00> : vector<8x128xf32>
    %10 = tpu.matmul %7, %6, %cst_9 {dimension_numbers = #tpu.dot_dimension_numbers<[1], [0], [0], [1], [0, 0, 1, 1], [], []>} : vector<8x32xbf16>, vector<32x128xbf16>, vector<8x128xf32> -> vector<8x128xf32>
    %11 = arith.addf %9, %10 : vector<8x128xf32>
    %cst_10 = arith.constant 5.000000e-01 : f32
    %12 = vector.broadcast %cst_10 : f32 to vector<8x128xf32>
    %13 = arith.mulf %12, %11 : vector<8x128xf32>
    %14 = math.tanh %13 : vector<8x128xf32>
    %cst_11 = arith.constant 1.000000e+00 : f32
    %15 = vector.broadcast %cst_11 : f32 to vector<8x128xf32>
    %16 = arith.addf %15, %14 : vector<8x128xf32>
    %cst_12 = arith.constant 5.000000e-01 : f32
    %17 = vector.broadcast %cst_12 : f32 to vector<8x128xf32>
    %18 = arith.mulf %17, %16 : vector<8x128xf32>
    %19 = math.tanh %11 : vector<8x128xf32>
    %20 = vector.extract_strided_slice %18 {offsets = [0, 0], sizes = [8, 32], strides = [1, 1]} : vector<8x128xf32> to vector<8x32xf32>
    %21 = vector.extract_strided_slice %18 {offsets = [0, 32], sizes = [8, 32], strides = [1, 1]} : vector<8x128xf32> to vector<8x32xf32>
    %22 = vector.extract_strided_slice %19 {offsets = [0, 64], sizes = [8, 32], strides = [1, 1]} : vector<8x128xf32> to vector<8x32xf32>
    %23 = vector.extract_strided_slice %18 {offsets = [0, 96], sizes = [8, 32], strides = [1, 1]} : vector<8x128xf32> to vector<8x32xf32>
    %24 = arith.mulf %21, %8 : vector<8x32xf32>
    %25 = arith.mulf %20, %22 : vector<8x32xf32>
    %26 = arith.addf %24, %25 : vector<8x32xf32>
    %27 = math.tanh %26 : vector<8x32xf32>
    %28 = arith.mulf %23, %27 : vector<8x32xf32>
    %29 = arith.truncf %28 : vector<8x32xf32> to vector<8x32xbf16>
    %30 = vector.extract_strided_slice %5 {offsets = [8, 0], sizes = [8, 128], strides = [1, 1]} : vector<64x128xf32> to vector<8x128xf32>
    %cst_13 = arith.constant dense<0.000000e+00> : vector<8x128xf32>
    %31 = tpu.matmul %29, %6, %cst_13 {dimension_numbers = #tpu.dot_dimension_numbers<[1], [0], [0], [1], [0, 0, 1, 1], [], []>} : vector<8x32xbf16>, vector<32x128xbf16>, vector<8x128xf32> -> vector<8x128xf32>
    %32 = arith.addf %30, %31 : vector<8x128xf32>
    %cst_14 = arith.constant 5.000000e-01 : f32
    %33 = vector.broadcast %cst_14 : f32 to vector<8x128xf32>
    %34 = arith.mulf %33, %32 : vector<8x128xf32>
    %35 = math.tanh %34 : vector<8x128xf32>
    %cst_15 = arith.constant 1.000000e+00 : f32
    %36 = vector.broadcast %cst_15 : f32 to vector<8x128xf32>
    %37 = arith.addf %36, %35 : vector<8x128xf32>
    %cst_16 = arith.constant 5.000000e-01 : f32
    %38 = vector.broadcast %cst_16 : f32 to vector<8x128xf32>
    %39 = arith.mulf %38, %37 : vector<8x128xf32>
    %40 = math.tanh %32 : vector<8x128xf32>
    %41 = vector.extract_strided_slice %39 {offsets = [0, 0], sizes = [8, 32], strides = [1, 1]} : vector<8x128xf32> to vector<8x32xf32>
    %42 = vector.extract_strided_slice %39 {offsets = [0, 32], sizes = [8, 32], strides = [1, 1]} : vector<8x128xf32> to vector<8x32xf32>
    %43 = vector.extract_strided_slice %40 {offsets = [0, 64], sizes = [8, 32], strides = [1, 1]} : vector<8x128xf32> to vector<8x32xf32>
    %44 = vector.extract_strided_slice %39 {offsets = [0, 96], sizes = [8, 32], strides = [1, 1]} : vector<8x128xf32> to vector<8x32xf32>
    %45 = arith.mulf %42, %26 : vector<8x32xf32>
    %46 = arith.mulf %41, %43 : vector<8x32xf32>
    %47 = arith.addf %45, %46 : vector<8x32xf32>
    %48 = math.tanh %47 : vector<8x32xf32>
    %49 = arith.mulf %44, %48 : vector<8x32xf32>
    %50 = arith.truncf %49 : vector<8x32xf32> to vector<8x32xbf16>
    %51 = vector.extract_strided_slice %5 {offsets = [16, 0], sizes = [8, 128], strides = [1, 1]} : vector<64x128xf32> to vector<8x128xf32>
    %cst_17 = arith.constant dense<0.000000e+00> : vector<8x128xf32>
    %52 = tpu.matmul %50, %6, %cst_17 {dimension_numbers = #tpu.dot_dimension_numbers<[1], [0], [0], [1], [0, 0, 1, 1], [], []>} : vector<8x32xbf16>, vector<32x128xbf16>, vector<8x128xf32> -> vector<8x128xf32>
    %53 = arith.addf %51, %52 : vector<8x128xf32>
    %cst_18 = arith.constant 5.000000e-01 : f32
    %54 = vector.broadcast %cst_18 : f32 to vector<8x128xf32>
    %55 = arith.mulf %54, %53 : vector<8x128xf32>
    %56 = math.tanh %55 : vector<8x128xf32>
    %cst_19 = arith.constant 1.000000e+00 : f32
    %57 = vector.broadcast %cst_19 : f32 to vector<8x128xf32>
    %58 = arith.addf %57, %56 : vector<8x128xf32>
    %cst_20 = arith.constant 5.000000e-01 : f32
    %59 = vector.broadcast %cst_20 : f32 to vector<8x128xf32>
    %60 = arith.mulf %59, %58 : vector<8x128xf32>
    %61 = math.tanh %53 : vector<8x128xf32>
    %62 = vector.extract_strided_slice %60 {offsets = [0, 0], sizes = [8, 32], strides = [1, 1]} : vector<8x128xf32> to vector<8x32xf32>
    %63 = vector.extract_strided_slice %60 {offsets = [0, 32], sizes = [8, 32], strides = [1, 1]} : vector<8x128xf32> to vector<8x32xf32>
    %64 = vector.extract_strided_slice %61 {offsets = [0, 64], sizes = [8, 32], strides = [1, 1]} : vector<8x128xf32> to vector<8x32xf32>
    %65 = vector.extract_strided_slice %60 {offsets = [0, 96], sizes = [8, 32], strides = [1, 1]} : vector<8x128xf32> to vector<8x32xf32>
    %66 = arith.mulf %63, %47 : vector<8x32xf32>
    %67 = arith.mulf %62, %64 : vector<8x32xf32>
    %68 = arith.addf %66, %67 : vector<8x32xf32>
    %69 = math.tanh %68 : vector<8x32xf32>
    %70 = arith.mulf %65, %69 : vector<8x32xf32>
    %71 = arith.truncf %70 : vector<8x32xf32> to vector<8x32xbf16>
    %72 = vector.extract_strided_slice %5 {offsets = [24, 0], sizes = [8, 128], strides = [1, 1]} : vector<64x128xf32> to vector<8x128xf32>
    %cst_21 = arith.constant dense<0.000000e+00> : vector<8x128xf32>
    %73 = tpu.matmul %71, %6, %cst_21 {dimension_numbers = #tpu.dot_dimension_numbers<[1], [0], [0], [1], [0, 0, 1, 1], [], []>} : vector<8x32xbf16>, vector<32x128xbf16>, vector<8x128xf32> -> vector<8x128xf32>
    %74 = arith.addf %72, %73 : vector<8x128xf32>
    %cst_22 = arith.constant 5.000000e-01 : f32
    %75 = vector.broadcast %cst_22 : f32 to vector<8x128xf32>
    %76 = arith.mulf %75, %74 : vector<8x128xf32>
    %77 = math.tanh %76 : vector<8x128xf32>
    %cst_23 = arith.constant 1.000000e+00 : f32
    %78 = vector.broadcast %cst_23 : f32 to vector<8x128xf32>
    %79 = arith.addf %78, %77 : vector<8x128xf32>
    %cst_24 = arith.constant 5.000000e-01 : f32
    %80 = vector.broadcast %cst_24 : f32 to vector<8x128xf32>
    %81 = arith.mulf %80, %79 : vector<8x128xf32>
    %82 = math.tanh %74 : vector<8x128xf32>
    %83 = vector.extract_strided_slice %81 {offsets = [0, 0], sizes = [8, 32], strides = [1, 1]} : vector<8x128xf32> to vector<8x32xf32>
    %84 = vector.extract_strided_slice %81 {offsets = [0, 32], sizes = [8, 32], strides = [1, 1]} : vector<8x128xf32> to vector<8x32xf32>
    %85 = vector.extract_strided_slice %82 {offsets = [0, 64], sizes = [8, 32], strides = [1, 1]} : vector<8x128xf32> to vector<8x32xf32>
    %86 = vector.extract_strided_slice %81 {offsets = [0, 96], sizes = [8, 32], strides = [1, 1]} : vector<8x128xf32> to vector<8x32xf32>
    %87 = arith.mulf %84, %68 : vector<8x32xf32>
    %88 = arith.mulf %83, %85 : vector<8x32xf32>
    %89 = arith.addf %87, %88 : vector<8x32xf32>
    %90 = math.tanh %89 : vector<8x32xf32>
    %91 = arith.mulf %86, %90 : vector<8x32xf32>
    %92 = arith.truncf %91 : vector<8x32xf32> to vector<8x32xbf16>
    %93 = vector.extract_strided_slice %5 {offsets = [32, 0], sizes = [8, 128], strides = [1, 1]} : vector<64x128xf32> to vector<8x128xf32>
    %cst_25 = arith.constant dense<0.000000e+00> : vector<8x128xf32>
    %94 = tpu.matmul %92, %6, %cst_25 {dimension_numbers = #tpu.dot_dimension_numbers<[1], [0], [0], [1], [0, 0, 1, 1], [], []>} : vector<8x32xbf16>, vector<32x128xbf16>, vector<8x128xf32> -> vector<8x128xf32>
    %95 = arith.addf %93, %94 : vector<8x128xf32>
    %cst_26 = arith.constant 5.000000e-01 : f32
    %96 = vector.broadcast %cst_26 : f32 to vector<8x128xf32>
    %97 = arith.mulf %96, %95 : vector<8x128xf32>
    %98 = math.tanh %97 : vector<8x128xf32>
    %cst_27 = arith.constant 1.000000e+00 : f32
    %99 = vector.broadcast %cst_27 : f32 to vector<8x128xf32>
    %100 = arith.addf %99, %98 : vector<8x128xf32>
    %cst_28 = arith.constant 5.000000e-01 : f32
    %101 = vector.broadcast %cst_28 : f32 to vector<8x128xf32>
    %102 = arith.mulf %101, %100 : vector<8x128xf32>
    %103 = math.tanh %95 : vector<8x128xf32>
    %104 = vector.extract_strided_slice %102 {offsets = [0, 0], sizes = [8, 32], strides = [1, 1]} : vector<8x128xf32> to vector<8x32xf32>
    %105 = vector.extract_strided_slice %102 {offsets = [0, 32], sizes = [8, 32], strides = [1, 1]} : vector<8x128xf32> to vector<8x32xf32>
    %106 = vector.extract_strided_slice %103 {offsets = [0, 64], sizes = [8, 32], strides = [1, 1]} : vector<8x128xf32> to vector<8x32xf32>
    %107 = vector.extract_strided_slice %102 {offsets = [0, 96], sizes = [8, 32], strides = [1, 1]} : vector<8x128xf32> to vector<8x32xf32>
    %108 = arith.mulf %105, %89 : vector<8x32xf32>
    %109 = arith.mulf %104, %106 : vector<8x32xf32>
    %110 = arith.addf %108, %109 : vector<8x32xf32>
    %111 = math.tanh %110 : vector<8x32xf32>
    %112 = arith.mulf %107, %111 : vector<8x32xf32>
    %113 = arith.truncf %112 : vector<8x32xf32> to vector<8x32xbf16>
    %114 = vector.extract_strided_slice %5 {offsets = [40, 0], sizes = [8, 128], strides = [1, 1]} : vector<64x128xf32> to vector<8x128xf32>
    %cst_29 = arith.constant dense<0.000000e+00> : vector<8x128xf32>
    %115 = tpu.matmul %113, %6, %cst_29 {dimension_numbers = #tpu.dot_dimension_numbers<[1], [0], [0], [1], [0, 0, 1, 1], [], []>} : vector<8x32xbf16>, vector<32x128xbf16>, vector<8x128xf32> -> vector<8x128xf32>
    %116 = arith.addf %114, %115 : vector<8x128xf32>
    %cst_30 = arith.constant 5.000000e-01 : f32
    %117 = vector.broadcast %cst_30 : f32 to vector<8x128xf32>
    %118 = arith.mulf %117, %116 : vector<8x128xf32>
    %119 = math.tanh %118 : vector<8x128xf32>
    %cst_31 = arith.constant 1.000000e+00 : f32
    %120 = vector.broadcast %cst_31 : f32 to vector<8x128xf32>
    %121 = arith.addf %120, %119 : vector<8x128xf32>
    %cst_32 = arith.constant 5.000000e-01 : f32
    %122 = vector.broadcast %cst_32 : f32 to vector<8x128xf32>
    %123 = arith.mulf %122, %121 : vector<8x128xf32>
    %124 = math.tanh %116 : vector<8x128xf32>
    %125 = vector.extract_strided_slice %123 {offsets = [0, 0], sizes = [8, 32], strides = [1, 1]} : vector<8x128xf32> to vector<8x32xf32>
    %126 = vector.extract_strided_slice %123 {offsets = [0, 32], sizes = [8, 32], strides = [1, 1]} : vector<8x128xf32> to vector<8x32xf32>
    %127 = vector.extract_strided_slice %124 {offsets = [0, 64], sizes = [8, 32], strides = [1, 1]} : vector<8x128xf32> to vector<8x32xf32>
    %128 = vector.extract_strided_slice %123 {offsets = [0, 96], sizes = [8, 32], strides = [1, 1]} : vector<8x128xf32> to vector<8x32xf32>
    %129 = arith.mulf %126, %110 : vector<8x32xf32>
    %130 = arith.mulf %125, %127 : vector<8x32xf32>
    %131 = arith.addf %129, %130 : vector<8x32xf32>
    %132 = math.tanh %131 : vector<8x32xf32>
    %133 = arith.mulf %128, %132 : vector<8x32xf32>
    %134 = arith.truncf %133 : vector<8x32xf32> to vector<8x32xbf16>
    %135 = vector.extract_strided_slice %5 {offsets = [48, 0], sizes = [8, 128], strides = [1, 1]} : vector<64x128xf32> to vector<8x128xf32>
    %cst_33 = arith.constant dense<0.000000e+00> : vector<8x128xf32>
    %136 = tpu.matmul %134, %6, %cst_33 {dimension_numbers = #tpu.dot_dimension_numbers<[1], [0], [0], [1], [0, 0, 1, 1], [], []>} : vector<8x32xbf16>, vector<32x128xbf16>, vector<8x128xf32> -> vector<8x128xf32>
    %137 = arith.addf %135, %136 : vector<8x128xf32>
    %cst_34 = arith.constant 5.000000e-01 : f32
    %138 = vector.broadcast %cst_34 : f32 to vector<8x128xf32>
    %139 = arith.mulf %138, %137 : vector<8x128xf32>
    %140 = math.tanh %139 : vector<8x128xf32>
    %cst_35 = arith.constant 1.000000e+00 : f32
    %141 = vector.broadcast %cst_35 : f32 to vector<8x128xf32>
    %142 = arith.addf %141, %140 : vector<8x128xf32>
    %cst_36 = arith.constant 5.000000e-01 : f32
    %143 = vector.broadcast %cst_36 : f32 to vector<8x128xf32>
    %144 = arith.mulf %143, %142 : vector<8x128xf32>
    %145 = math.tanh %137 : vector<8x128xf32>
    %146 = vector.extract_strided_slice %144 {offsets = [0, 0], sizes = [8, 32], strides = [1, 1]} : vector<8x128xf32> to vector<8x32xf32>
    %147 = vector.extract_strided_slice %144 {offsets = [0, 32], sizes = [8, 32], strides = [1, 1]} : vector<8x128xf32> to vector<8x32xf32>
    %148 = vector.extract_strided_slice %145 {offsets = [0, 64], sizes = [8, 32], strides = [1, 1]} : vector<8x128xf32> to vector<8x32xf32>
    %149 = vector.extract_strided_slice %144 {offsets = [0, 96], sizes = [8, 32], strides = [1, 1]} : vector<8x128xf32> to vector<8x32xf32>
    %150 = arith.mulf %147, %131 : vector<8x32xf32>
    %151 = arith.mulf %146, %148 : vector<8x32xf32>
    %152 = arith.addf %150, %151 : vector<8x32xf32>
    %153 = math.tanh %152 : vector<8x32xf32>
    %154 = arith.mulf %149, %153 : vector<8x32xf32>
    %155 = arith.truncf %154 : vector<8x32xf32> to vector<8x32xbf16>
    %156 = vector.extract_strided_slice %5 {offsets = [56, 0], sizes = [8, 128], strides = [1, 1]} : vector<64x128xf32> to vector<8x128xf32>
    %cst_37 = arith.constant dense<0.000000e+00> : vector<8x128xf32>
    %157 = tpu.matmul %155, %6, %cst_37 {dimension_numbers = #tpu.dot_dimension_numbers<[1], [0], [0], [1], [0, 0, 1, 1], [], []>} : vector<8x32xbf16>, vector<32x128xbf16>, vector<8x128xf32> -> vector<8x128xf32>
    %158 = arith.addf %156, %157 : vector<8x128xf32>
    %cst_38 = arith.constant 5.000000e-01 : f32
    %159 = vector.broadcast %cst_38 : f32 to vector<8x128xf32>
    %160 = arith.mulf %159, %158 : vector<8x128xf32>
    %161 = math.tanh %160 : vector<8x128xf32>
    %cst_39 = arith.constant 1.000000e+00 : f32
    %162 = vector.broadcast %cst_39 : f32 to vector<8x128xf32>
    %163 = arith.addf %162, %161 : vector<8x128xf32>
    %cst_40 = arith.constant 5.000000e-01 : f32
    %164 = vector.broadcast %cst_40 : f32 to vector<8x128xf32>
    %165 = arith.mulf %164, %163 : vector<8x128xf32>
    %166 = math.tanh %158 : vector<8x128xf32>
    %167 = vector.extract_strided_slice %165 {offsets = [0, 0], sizes = [8, 32], strides = [1, 1]} : vector<8x128xf32> to vector<8x32xf32>
    %168 = vector.extract_strided_slice %165 {offsets = [0, 32], sizes = [8, 32], strides = [1, 1]} : vector<8x128xf32> to vector<8x32xf32>
    %169 = vector.extract_strided_slice %166 {offsets = [0, 64], sizes = [8, 32], strides = [1, 1]} : vector<8x128xf32> to vector<8x32xf32>
    %170 = vector.extract_strided_slice %165 {offsets = [0, 96], sizes = [8, 32], strides = [1, 1]} : vector<8x128xf32> to vector<8x32xf32>
    %171 = arith.mulf %168, %152 : vector<8x32xf32>
    %172 = arith.mulf %167, %169 : vector<8x32xf32>
    %173 = arith.addf %171, %172 : vector<8x32xf32>
    %174 = math.tanh %173 : vector<8x32xf32>
    %175 = arith.mulf %170, %174 : vector<8x32xf32>
    %cst_41 = arith.constant 0.000000e+00 : f32
    %176 = vector.broadcast %cst_41 : f32 to vector<8x32xf32>
    %177 = arith.maximumf %175, %176 : vector<8x32xf32>
    %c0_42 = arith.constant 0 : index
    %c0_43 = arith.constant 0 : index
    %178 = vector.load %arg4[%c0_42, %c0_43] : memref<32x8xf32, #tpu.memory_space<vmem>>, vector<32x8xf32>
    %cst_44 = arith.constant dense<0.000000e+00> : vector<8x8xf32>
    %179 = tpu.matmul %177, %178, %cst_44 {dimension_numbers = #tpu.dot_dimension_numbers<[1], [0], [0], [1], [0, 0, 1, 1], [], []>} : vector<8x32xf32>, vector<32x8xf32>, vector<8x8xf32> -> vector<8x8xf32>
    %c0_45 = arith.constant 0 : index
    %c0_46 = arith.constant 0 : index
    %180 = vector.load %arg5[%c0_45, %c0_46] : memref<1x8xf32, #tpu.memory_space<vmem>>, vector<1x8xf32>
    %181 = vector.broadcast %180 : vector<1x8xf32> to vector<8x8xf32>
    %182 = arith.addf %179, %181 : vector<8x8xf32>
    %cst_47 = arith.constant dense<0xFF800000> : vector<8xf32>
    %183 = vector.multi_reduction <maximumf>, %182, %cst_47 [1] : vector<8x8xf32> to vector<8xf32>
    %184 = vector.shape_cast %183 : vector<8xf32> to vector<8x1xf32>
    %185 = vector.broadcast %184 : vector<8x1xf32> to vector<8x8xf32>
    %186 = arith.subf %182, %185 : vector<8x8xf32>
    %187 = math.exp %186 : vector<8x8xf32>
    %cst_48 = arith.constant dense<0.000000e+00> : vector<8xf32>
    %188 = vector.multi_reduction <add>, %187, %cst_48 [1] : vector<8x8xf32> to vector<8xf32>
    %189 = vector.shape_cast %188 : vector<8xf32> to vector<8x1xf32>
    %190 = tpu.reciprocal %189 {approx = true} : vector<8x1xf32> -> vector<8x1xf32>
    %191 = vector.broadcast %190 : vector<8x1xf32> to vector<8x8xf32>
    %192 = arith.mulf %187, %191 : vector<8x8xf32>
    %c0_49 = arith.constant 0 : index
    %c0_50 = arith.constant 0 : index
    %193 = vector.load %arg6[%c0_49, %c0_50] : memref<8x8xf32, #tpu.memory_space<vmem>>, vector<8x8xf32>
    tpu.vector_store %arg6[%c0_49, %c0_50], %192 {strides = array<i32>} : memref<8x8xf32, #tpu.memory_space<vmem>>, vector<8x8xf32>,
    return
  }
}

</mosaic_0001>

<bundles_post_ra>
// kernel: lstm_basic_dropout_forward.1
= control target key start
LH: loop header
LB: loop body
LE: loop exit
PB: predicated region body
PF: predicated region fallthrough
CT: control target
= control target key end

     0   :  { %vm62_vm0 = vcmask 1043456   ;;  %vm37_vm1 = vcmask 31744   ;;  %v600_v4 = vmov 0   ;;  %s601_s29 = smov 64   ;;  %vm123_vm2 = vcmask 261120   ;;  %s776_s2 = inlined_call_operand.vmem [shape: bf16[32,128], index: 2, kind: input, shape index: {}]   ;;  %s777_s1 = inlined_call_operand.vmem [shape: f32[4,128], index: 1, kind: input, shape index: {}]   ;;  %s778_s0 = inlined_call_operand.vmem [shape: f32[64,4], index: 0, kind: input, shape index: {}]   ;;  %s779_s3 = inlined_call_operand.vmem [shape: f32[1,128], index: 3, kind: input, shape index: {}]   ;;  %s780_s4 = inlined_call_operand.vmem [shape: f32[32,8], index: 4, kind: input, shape index: {}]   ;;  %s781_s5 = inlined_call_operand.vmem [shape: f32[1,8], index: 5, kind: input, shape index: {}]   ;;  %s782_s6 = inlined_call_operand.vmem [shape: f32[8,8], index: 6, kind: output, shape index: {}]  }
   0x1   :  { %v641_v0 = vld [vmem:[%s776_s2 + $0x8] sm:$0xff]  ;;  %v32_v1 = vld [vmem:[%s777_s1] sm:$0xf]  ;;  %v31_v43 = vld [vmem:[%s778_s0 + $0x38] sm:$0xff]  ;;  %vm498_vm3 = vcmask 64512  }
   0x2   :  { %515 = vmatpush.msk.msra.mxu0 %vm62_vm0, %v32_v1  ;;  %v24_v2 = vld [vmem:[%s778_s0] sm:$0xff]  ;;  %542 = vmatpush.msk.msra.mxu3 %vm62_vm0, %v32_v1  ;;  %v25_v25 = vld [vmem:[%s778_s0 + $0x8] sm:$0xff]  ;;  %v26_v47 = vld [vmem:[%s778_s0 + $0x10] sm:$0xff] }
   0x3   :  { %133 = vmatpush.bf16.msra.mxu1 %v641_v0  ;;  %v653_v3 = vld [vmem:[%s776_s2] sm:$0xff]  ;;  %516 = vmatmul.msk.f32.vlgmr.msra.gmra.mxu0 %vm37_vm1, %v24_v2  ;;  %v27_v2 = vld [vmem:[%s778_s0 + $0x18] sm:$0xff] }
   0x4   :  { %176 = vmatpush.bf16.msra.mxu2 %v641_v0  ;;  %219 = vmatpush.bf16.msrb.mxu3 %v641_v0  ;;  %v670_v5 = vld [vmem:[%s779_s3] ss:$0 sm:$0xff]  ;;  %s602_s3 = smov 32  }
   0x5   :  { %523 = vmatmul.msk.f32.vlgmr.msra.gmra.mxu3 %vm37_vm1, %v31_v43 }
   0x7   :  { %134 = vmatpush.bf16.msra.mxu1 %v653_v3 }
   0x8   :  { %177 = vmatpush.bf16.msra.mxu2 %v653_v3  ;;  %220 = vmatpush.bf16.msrb.mxu3 %v653_v3 }
   0xa   :  { %135 = vmatmul.bf16.vlgmr.msra.gmra.mxu1 %v600_v4 }
   0xb   :  { %262 = vmatpush.bf16.msrb.mxu1 %v641_v0  ;;  %517 = vmatmul.msk.f32.gmra.mxu0 %vm37_vm1, %v25_v25 }
   0xc   :  { %305 = vmatpush.bf16.msrb.mxu2 %v641_v0  ;;  %348 = vmatpush.bf16.msra.mxu3 %v641_v0 }
   0xf   :  { %263 = vmatpush.bf16.msrb.mxu1 %v653_v3 }
  0x10   :  { %306 = vmatpush.bf16.msrb.mxu2 %v653_v3  ;;  %349 = vmatpush.bf16.msra.mxu3 %v653_v3 }
  0x13   :  { %391 = vmatpush.bf16.msra.mxu1 %v641_v0  ;;  %518 = vmatmul.msk.f32.gmra.mxu0 %vm37_vm1, %v26_v47 }
  0x17   :  { %392 = vmatpush.bf16.msra.mxu1 %v653_v3 }
  0x1b   :  { %519 = vmatmul.msk.f32.gmra.mxu0 %vm37_vm1, %v27_v2 }
  0x80   :  { %v83_v6 = vpop.f32.mrf.mxu0 }
  0x81   :  { %v84_v7 = vadd.f32 %v670_v5, %v83_v6 }
  0x87   :  { %v136_v8 = vpop.f32.mrf.mxu1 }
  0x88   :  { %v140_v9 = vadd.f32 %v136_v8, %v84_v7  ;;  %v86_v27 = vpop.f32.mrf.mxu0  ;;  %v700_v49 = vpop.f32.mrf.mxu3 }
  0x89   :  { %v87_v28 = vadd.f32 %v670_v5, %v86_v27  ;;  %v28_v27 = vld [vmem:[%s778_s0 + $0x20] sm:$0xff] }
  0x8a   :  { %548 = vtanh.f32 %v140_v9  ;;  %v141_v12 = vmul.f32 0.5, %v140_v9  ;;  %520 = vmatmul.msk.f32.gmra.mxu0 %vm37_vm1, %v28_v27 }
  0x8c   :  { %550 = vtanh.f32 %v141_v12 }
  0x8f   :  { %v138_v10 = vpop.f32.mrf.mxu1 }
  0x90   :  { %v549_v11 = vpop.eup %548  ;;  %v89_v50 = vpop.f32.mrf.mxu0 }
  0x91   :  { %148 = vrot.lane.b32.xlu0 %v549_v11, %s601_s29  ;;  %v90_v51 = vadd.f32 %v670_v5, %v89_v50 }
  0x92   :  { %v551_v13 = vpop.eup %550 }
  0x93   :  { %v143_v14 = vadd.f32 1.0, %v551_v13 }
  0x95   :  { %v144_v15 = vmul.f32 0.5, %v143_v14 }
  0x97   :  { %v146_v18 = vmul.f32 0.0, %v144_v15 }
  0x98   :  { %v92_v8 = vpop.f32.mrf.mxu0 }
  0x99   :  { %v93_v9 = vadd.f32 %v670_v5, %v92_v8 }
 0x103   :  { %v149_v16 = vpop.permute.xlu0 %148 }
 0x104   :  { %v151_v17 = vmul.f32 %v149_v16, %v144_v15 }
 0x106   :  { %153 = vrot.lane.b32.xlu0 %v151_v17, %s602_s3 }
 0x178   :  { %v154_v19 = vpop.permute.xlu0 %153 }
 0x179   :  { %v156_v20 = vadd.f32 %v154_v19, %v146_v18 }
 0x17b   :  { %552 = vtanh.f32 %v156_v20 }
 0x181   :  { %v553_v21 = vpop.eup %552 }
 0x182   :  { %159 = vrot.lane.b32.xlu1 %v553_v21, %s601_s29 }
 0x1f4   :  { %v160_v22 = vpop.permute.xlu1 %159 }
 0x1f5   :  { %v162_v23 = vmul.f32 %v160_v22, %v144_v15 }
 0x1f7   :  { %v163_v24 = vpack.c.bf16 %v162_v23, %v162_v23 }
 0x1f9   :  { %165 = vrot.lane.b32.xlu1 %v163_v24, %s602_s3 }
 0x26b   :  { %v166_v26 = vpop.permute.xlu1 %165 }
 0x26c   :  { %532 = vmatmul.msk.bf16.vlgmr.msra.gmra.mxu2 %vm123_vm2, %v166_v26 }
 0x26d   :  { %434 = vmatpush.bf16.msra.mxu2 %v641_v0 }
 0x271   :  { %435 = vmatpush.bf16.msra.mxu2 %v653_v3 }
 0x2ef   :  { %v179_v29 = vpop.f32.mrf.mxu2 }
 0x2f0   :  { %v183_v30 = vadd.f32 %v179_v29, %v87_v28  ;;  %v95_v29 = vpop.f32.mrf.mxu0 }
 0x2f2   :  { %554 = vtanh.f32 %v183_v30  ;;  %v184_v33 = vmul.f32 0.5, %v183_v30  ;;  %v96_v30 = vadd.f32 %v670_v5, %v95_v29  ;;  %v105_v29 = vadd.f32 %v670_v5, %v700_v49  ;;  %v468_v49 = vld [vmem:[%s780_s4 + $0x18] sm:$0xff] }
 0x2f4   :  { %556 = vtanh.f32 %v184_v33 }
 0x2f7   :  { %v181_v31 = vpop.f32.mrf.mxu2 }
 0x2f8   :  { %v555_v32 = vpop.eup %554 }
 0x2f9   :  { %191 = vrot.lane.b32.xlu2 %v555_v32, %s601_s29 }
 0x2fa   :  { %v557_v34 = vpop.eup %556 }
 0x2fb   :  { %v186_v35 = vadd.f32 1.0, %v557_v34 }
 0x2fd   :  { %v187_v36 = vmul.f32 0.5, %v186_v35 }
 0x2ff   :  { %v189_v39 = vmul.f32 %v187_v36, %v156_v20 }
 0x353   :  { %v192_v37 = vpop.permute.xlu2 %191 }
 0x354   :  { %v194_v38 = vmul.f32 %v192_v37, %v187_v36 }
 0x356   :  { %196 = vrot.lane.b32.xlu2 %v194_v38, %s602_s3 }
 0x3b0   :  { %v197_v40 = vpop.permute.xlu2 %196 }
 0x3b1   :  { %v199_v41 = vadd.f32 %v197_v40, %v189_v39 }
 0x3b3   :  { %558 = vtanh.f32 %v199_v41 }
 0x3b9   :  { %v559_v42 = vpop.eup %558 }
 0x3ba   :  { %202 = vrot.lane.b32.xlu0 %v559_v42, %s601_s29 }
 0x42c   :  { %v203_v44 = vpop.permute.xlu0 %202 }
 0x42d   :  { %v205_v45 = vmul.f32 %v203_v44, %v187_v36 }
 0x42f   :  { %v206_v46 = vpack.c.bf16 %v205_v45, %v205_v45 }
 0x431   :  { %208 = vrot.lane.b32.xlu1 %v206_v46, %s602_s3 }
 0x4a3   :  { %v209_v48 = vpop.permute.xlu1 %208 }
 0x4a4   :  { %533 = vmatmul.msk.bf16.vlgmr.msrb.gmra.mxu3 %vm123_vm2, %v209_v48  ;;  %v29_v48 = vld [vmem:[%s778_s0 + $0x28] sm:$0xff] }
 0x4a5   :  { %521 = vmatmul.msk.f32.gmra.mxu0 %vm37_vm1, %v29_v48  ;;  %490 = vmatpush.msrb.mxu3 %v468_v49 }
 0x527   :  { %v222_v52 = vpop.f32.mrf.mxu3 }
 0x528   :  { %v226_v53 = vadd.f32 %v222_v52, %v90_v51  ;;  %v98_v51 = vpop.f32.mrf.mxu0 }
 0x529   :  { %v99_v52 = vadd.f32 %v670_v5, %v98_v51  ;;  %v547_v51 = vld [vmem:[%s781_s5] ss:$0 sm:$0xff] }
 0x52a   :  { %560 = vtanh.f32 %v226_v53  ;;  %v227_v56 = vmul.f32 0.5, %v226_v53 }
 0x52c   :  { %562 = vtanh.f32 %v227_v56 }
 0x52f   :  { %v224_v54 = vpop.f32.mrf.mxu3 }
 0x530   :  { %v561_v55 = vpop.eup %560 }
 0x531   :  { %234 = vrot.lane.b32.xlu2 %v561_v55, %s601_s29 }
 0x532   :  { %v563_v57 = vpop.eup %562 }
 0x533   :  { %v229_v58 = vadd.f32 1.0, %v563_v57 }
 0x535   :  { %v230_v59 = vmul.f32 0.5, %v229_v58 }
 0x537   :  { %v232_v62 = vmul.f32 %v230_v59, %v199_v41 }
 0x58b   :  { %v235_v60 = vpop.permute.xlu2 %234 }
 0x58c   :  { %v237_v61 = vmul.f32 %v235_v60, %v230_v59 }
 0x58e   :  { %239 = vrot.lane.b32.xlu0 %v237_v61, %s602_s3 }
 0x600   :  { %v240_v63 = vpop.permute.xlu0 %239 }
 0x601   :  { %v242_v0 = vadd.f32 %v240_v63, %v232_v62 }
 0x603   :  { %564 = vtanh.f32 %v242_v0 }
 0x609   :  { %v565_v1 = vpop.eup %564 }
 0x60a   :  { %245 = vrot.lane.b32.xlu1 %v565_v1, %s601_s29 }
 0x67c   :  { %v246_v3 = vpop.permute.xlu1 %245 }
 0x67d   :  { %v248_v4 = vmul.f32 %v246_v3, %v230_v59  ;;  %v30_v3 = vld [vmem:[%s778_s0 + $0x30] sm:$0xff] }
 0x67e   :  { %522 = vmatmul.msk.f32.gmra.mxu0 %vm37_vm1, %v30_v3 }
 0x67f   :  { %v249_v6 = vpack.c.bf16 %v248_v4, %v248_v4 }
 0x681   :  { %251 = vrot.lane.b32.xlu2 %v249_v6, %s602_s3 }
 0x6db   :  { %v252_v7 = vpop.permute.xlu2 %251 }
 0x6dc   :  { %534 = vmatmul.msk.bf16.vlgmr.msrb.gmra.mxu1 %vm123_vm2, %v252_v7 }
 0x759   :  { %v265_v10 = vpop.f32.mrf.mxu1 }
 0x75a   :  { %v269_v11 = vadd.f32 %v265_v10, %v93_v9  ;;  %v101_v9 = vpop.f32.mrf.mxu0 }
 0x75b   :  { %v102_v10 = vadd.f32 %v670_v5, %v101_v9 }
 0x75c   :  { %566 = vtanh.f32 %v269_v11  ;;  %v270_v14 = vmul.f32 0.5, %v269_v11 }
 0x75e   :  { %568 = vtanh.f32 %v270_v14 }
 0x761   :  { %v267_v12 = vpop.f32.mrf.mxu1 }
 0x762   :  { %v567_v13 = vpop.eup %566 }
 0x763   :  { %277 = vrot.lane.b32.xlu0 %v567_v13, %s601_s29 }
 0x764   :  { %v569_v15 = vpop.eup %568 }
 0x765   :  { %v272_v16 = vadd.f32 1.0, %v569_v15 }
 0x767   :  { %v273_v17 = vmul.f32 0.5, %v272_v16 }
 0x769   :  { %v275_v20 = vmul.f32 %v273_v17, %v242_v0 }
 0x7d5   :  { %v278_v18 = vpop.permute.xlu0 %277 }
 0x7d6   :  { %v280_v19 = vmul.f32 %v278_v18, %v273_v17 }
 0x7d8   :  { %282 = vrot.lane.b32.xlu1 %v280_v19, %s602_s3 }
 0x84a   :  { %v283_v21 = vpop.permute.xlu1 %282 }
 0x84b   :  { %v285_v22 = vadd.f32 %v283_v21, %v275_v20 }
 0x84d   :  { %570 = vtanh.f32 %v285_v22 }
 0x853   :  { %v571_v23 = vpop.eup %570 }
 0x854   :  { %288 = vrot.lane.b32.xlu2 %v571_v23, %s601_s29 }
 0x8ae   :  { %v289_v24 = vpop.permute.xlu2 %288 }
 0x8af   :  { %v291_v25 = vmul.f32 %v289_v24, %v273_v17 }
 0x8b1   :  { %v292_v26 = vpack.c.bf16 %v291_v25, %v291_v25 }
 0x8b3   :  { %294 = vrot.lane.b32.xlu0 %v292_v26, %s602_s3 }
 0x925   :  { %v295_v28 = vpop.permute.xlu0 %294 }
 0x926   :  { %535 = vmatmul.msk.bf16.vlgmr.msrb.gmra.mxu2 %vm123_vm2, %v295_v28 }
 0x9a9   :  { %v308_v31 = vpop.f32.mrf.mxu2 }
 0x9aa   :  { %v312_v32 = vadd.f32 %v308_v31, %v96_v30 }
 0x9ac   :  { %572 = vtanh.f32 %v312_v32  ;;  %v313_v35 = vmul.f32 0.5, %v312_v32 }
 0x9ae   :  { %574 = vtanh.f32 %v313_v35 }
 0x9b1   :  { %v310_v33 = vpop.f32.mrf.mxu2 }
 0x9b2   :  { %v573_v34 = vpop.eup %572 }
 0x9b3   :  { %320 = vrot.lane.b32.xlu1 %v573_v34, %s601_s29 }
 0x9b4   :  { %v575_v36 = vpop.eup %574 }
 0x9b5   :  { %v315_v37 = vadd.f32 1.0, %v575_v36 }
 0x9b7   :  { %v316_v38 = vmul.f32 0.5, %v315_v37 }
 0x9b9   :  { %v318_v41 = vmul.f32 %v316_v38, %v285_v22 }
 0xa25   :  { %v321_v39 = vpop.permute.xlu1 %320 }
 0xa26   :  { %v323_v40 = vmul.f32 %v321_v39, %v316_v38 }
 0xa28   :  { %325 = vrot.lane.b32.xlu2 %v323_v40, %s602_s3 }
 0xa82   :  { %v326_v42 = vpop.permute.xlu2 %325 }
 0xa83   :  { %v328_v43 = vadd.f32 %v326_v42, %v318_v41 }
 0xa85   :  { %576 = vtanh.f32 %v328_v43 }
 0xa8b   :  { %v577_v44 = vpop.eup %576 }
 0xa8c   :  { %331 = vrot.lane.b32.xlu0 %v577_v44, %s601_s29  ;;  %v466_v44 = vld [vmem:[%s780_s4 + $0x8] sm:$0xff] }
 0xafe   :  { %v332_v45 = vpop.permute.xlu0 %331 }
 0xaff   :  { %v334_v46 = vmul.f32 %v332_v45, %v316_v38  ;;  %v465_v45 = vld [vmem:[%s780_s4] sm:$0xff] }
 0xb01   :  { %v335_v47 = vpack.c.bf16 %v334_v46, %v334_v46 }
 0xb03   :  { %337 = vrot.lane.b32.xlu1 %v335_v47, %s602_s3 }
 0xb75   :  { %v338_v50 = vpop.permute.xlu1 %337 }
 0xb76   :  { %536 = vmatmul.msk.bf16.vlgmr.msra.gmra.mxu3 %vm123_vm2, %v338_v50 }
 0xbf9   :  { %v351_v53 = vpop.f32.mrf.mxu3 }
 0xbfa   :  { %v355_v54 = vadd.f32 %v351_v53, %v99_v52 }
 0xbfc   :  { %578 = vtanh.f32 %v355_v54  ;;  %v356_v57 = vmul.f32 0.5, %v355_v54 }
 0xbfe   :  { %580 = vtanh.f32 %v356_v57 }
 0xc01   :  { %v353_v55 = vpop.f32.mrf.mxu3 }
 0xc02   :  { %v579_v56 = vpop.eup %578 }
 0xc03   :  { %363 = vrot.lane.b32.xlu2 %v579_v56, %s601_s29 }
 0xc04   :  { %v581_v58 = vpop.eup %580 }
 0xc05   :  { %v358_v59 = vadd.f32 1.0, %v581_v58 }
 0xc07   :  { %v359_v60 = vmul.f32 0.5, %v358_v59 }
 0xc09   :  { %v361_v63 = vmul.f32 %v359_v60, %v328_v43  ;;  %v467_v43 = vld [vmem:[%s780_s4 + $0x10] sm:$0xff] }
 0xc0a   :  { %491 = vmatpush.msrb.mxu3 %v467_v43 }
 0xc0c   :  { %492 = vmatpush.msrb.mxu3 %v466_v44 }
 0xc0e   :  { %493 = vmatpush.msrb.mxu3 %v465_v45 }
 0xc5d   :  { %v364_v61 = vpop.permute.xlu2 %363 }
 0xc5e   :  { %v366_v62 = vmul.f32 %v364_v61, %v359_v60 }
 0xc60   :  { %368 = vrot.lane.b32.xlu0 %v366_v62, %s602_s3 }
 0xcd2   :  { %v369_v0 = vpop.permute.xlu0 %368 }
 0xcd3   :  { %v371_v1 = vadd.f32 %v369_v0, %v361_v63 }
 0xcd5   :  { %582 = vtanh.f32 %v371_v1 }
 0xcdb   :  { %v583_v2 = vpop.eup %582 }
 0xcdc   :  { %374 = vrot.lane.b32.xlu1 %v583_v2, %s601_s29 }
 0xd4e   :  { %v375_v4 = vpop.permute.xlu1 %374 }
 0xd4f   :  { %v377_v6 = vmul.f32 %v375_v4, %v359_v60 }
 0xd51   :  { %v378_v7 = vpack.c.bf16 %v377_v6, %v377_v6 }
 0xd53   :  { %380 = vrot.lane.b32.xlu2 %v378_v7, %s602_s3 }
 0xdad   :  { %v381_v8 = vpop.permute.xlu2 %380 }
 0xdae   :  { %537 = vmatmul.msk.bf16.vlgmr.msra.gmra.mxu1 %vm123_vm2, %v381_v8 }
 0xe2b   :  { %v394_v11 = vpop.f32.mrf.mxu1 }
 0xe2c   :  { %v398_v12 = vadd.f32 %v394_v11, %v102_v10 }
 0xe2e   :  { %584 = vtanh.f32 %v398_v12  ;;  %v399_v15 = vmul.f32 0.5, %v398_v12 }
 0xe30   :  { %586 = vtanh.f32 %v399_v15 }
 0xe33   :  { %v396_v13 = vpop.f32.mrf.mxu1 }
 0xe34   :  { %v585_v14 = vpop.eup %584 }
 0xe35   :  { %406 = vrot.lane.b32.xlu0 %v585_v14, %s601_s29 }
 0xe36   :  { %v587_v16 = vpop.eup %586 }
 0xe37   :  { %v401_v17 = vadd.f32 1.0, %v587_v16 }
 0xe39   :  { %v402_v18 = vmul.f32 0.5, %v401_v17 }
 0xe3b   :  { %v404_v21 = vmul.f32 %v402_v18, %v371_v1 }
 0xea7   :  { %v407_v19 = vpop.permute.xlu0 %406 }
 0xea8   :  { %v409_v20 = vmul.f32 %v407_v19, %v402_v18 }
 0xeaa   :  { %411 = vrot.lane.b32.xlu1 %v409_v20, %s602_s3 }
 0xf1c   :  { %v412_v22 = vpop.permute.xlu1 %411 }
 0xf1d   :  { %v414_v23 = vadd.f32 %v412_v22, %v404_v21 }
 0xf1f   :  { %588 = vtanh.f32 %v414_v23 }
 0xf25   :  { %v589_v24 = vpop.eup %588 }
 0xf26   :  { %417 = vrot.lane.b32.xlu2 %v589_v24, %s601_s29 }
 0xf80   :  { %v418_v25 = vpop.permute.xlu2 %417 }
 0xf81   :  { %v420_v26 = vmul.f32 %v418_v25, %v402_v18 }
 0xf83   :  { %v421_v27 = vpack.c.bf16 %v420_v26, %v420_v26 }
 0xf85   :  { %423 = vrot.lane.b32.xlu0 %v421_v27, %s602_s3 }
 0xff7   :  { %v424_v28 = vpop.permute.xlu0 %423 }
 0xff8   :  { %538 = vmatmul.msk.bf16.vlgmr.msra.gmra.mxu2 %vm123_vm2, %v424_v28 }
0x107b   :  { %v437_v30 = vpop.f32.mrf.mxu2 }
0x107c   :  { %v441_v31 = vadd.f32 %v437_v30, %v105_v29 }
0x107e   :  { %590 = vtanh.f32 %v441_v31  ;;  %v442_v34 = vmul.f32 0.5, %v441_v31 }
0x1080   :  { %592 = vtanh.f32 %v442_v34 }
0x1083   :  { %v439_v32 = vpop.f32.mrf.mxu2 }
0x1084   :  { %v591_v33 = vpop.eup %590 }
0x1085   :  { %449 = vrot.lane.b32.xlu1 %v591_v33, %s601_s29 }
0x1086   :  { %v593_v35 = vpop.eup %592 }
0x1087   :  { %v444_v36 = vadd.f32 1.0, %v593_v35 }
0x1089   :  { %v445_v37 = vmul.f32 0.5, %v444_v36 }
0x108b   :  { %v447_v40 = vmul.f32 %v445_v37, %v414_v23 }
0x10f7   :  { %v450_v38 = vpop.permute.xlu1 %449 }
0x10f8   :  { %v452_v39 = vmul.f32 %v450_v38, %v445_v37 }
0x10fa   :  { %454 = vrot.lane.b32.xlu2 %v452_v39, %s602_s3 }
0x1154   :  { %v455_v41 = vpop.permute.xlu2 %454 }
0x1155   :  { %v457_v42 = vadd.f32 %v455_v41, %v447_v40 }
0x1157   :  { %594 = vtanh.f32 %v457_v42 }
0x115d   :  { %v595_v5 = vpop.eup %594 }
0x115e   :  { %460 = vrot.lane.b32.xlu0 %v595_v5, %s601_s29 }
0x11d0   :  { %v461_v46 = vpop.permute.xlu0 %460 }
0x11d1   :  { %v463_v47 = vmul.f32 %v461_v46, %v445_v37 }
0x11d3   :  { %v464_v48 = vmax.f32 %v463_v47, 0.0 }
0x11d5   :  { %474 = vrot.lane.b32.xlu1 %v464_v48, %s602_s3 }
0x1247   :  { %v475_v50 = vpop.permute.xlu1 %474 }
0x1248   :  { %539 = vmatmul.msk.f32.vlgmr.msrb.gmra.mxu3 %vm123_vm2, %v475_v50 }
0x12cb   :  { %v495_v52 = vpop.f32.mrf.mxu3 }
0x12cc   :  { %v496_v53 = vadd.f32 %v547_v51, %v495_v52 }
0x12ce   :  { %v499_v54 = vsel %vm498_vm3, %v496_v53, -inf }
0x12cf   :  { %500 = vmax.xlane.f32.xlu2 %v499_v54 }
0x1342   :  { %v501_v55 = vpop.xlane.xlu2 %500 }
0x1343   :  { %v502_v56 = vsub.f32 %v496_v53, %v501_v55 }
0x1345   :  { %v503_v57 = vmul.f32 1.442695, %v502_v56 }
0x1347   :  { %596 = vpow2.f32 %v503_v57 }
0x134d   :  { %v597_v58 = vpop.eup %596 }
0x134e   :  { %v505_v59 = vsel %vm498_vm3, %v597_v58, 0.0 }
0x134f   :  { %506 = vadd.xlane.f32.xlu0 %v505_v59 }
0x13c2   :  { %v507_v60 = vpop.xlane.xlu0 %506 }
0x13c3   :  { %598 = vrcp.f32 %v507_v60 }
0x13c9   :  { %v599_v61 = vpop.eup %598 }
0x13ca   :  { %v509_v62 = vmul.f32 %v599_v61, %v597_v58 }
0x13cc   :  { %510 = vst.msk [vmem:[%s782_s6] sm:$0xff] %vm498_vm3, %v509_v62 }

</bundles_post_ra>
